<compile_context>
chip_gen: v7x
topology: tpu7x:2x2x1
jax: 0.10.0
libtpu: 0.0.40
codegen_flags: <defaults>
</compile_context>

<pallas_src>
import math

import jax
import jax.numpy as jnp
from jax.experimental import pallas as pl
from jax.experimental.pallas import tpu as pltpu


def _round_up(n: int, m: int) -> int:
    return ((n + m - 1) // m) * m


def mlp_kernel(x_ref, w1_ref, b1_ref, w2_ref, b2_ref, o_ref):
    # x_ref : [TB, in_size]    f32  (streamed per batch tile; cast to bf16 here)
    # w1_ref: [in_size, hid_p] bf16 (resident across the whole grid)
    # b1_ref: [1, hid_p]       f32  (resident)
    # w2_ref: [hid_p, out_p]   bf16 (resident)
    # b2_ref: [1, out_p]       f32  (resident)
    # o_ref : [TB, out_p]      f32
    # In-kernel bf16 cast (VPU) avoids an extra HBM round trip in the wrapper.
    x = x_ref[...].astype(jnp.bfloat16)
    h = jnp.dot(x, w1_ref[...], preferred_element_type=jnp.float32)
    # Bias + ReLU in f32 on the accumulator (v5e has no bf16 VALU).
    h = jnp.maximum(h + b1_ref[...], 0.0)
    # Single downcast right before the second MXU pass.
    h = h.astype(jnp.bfloat16)
    out = jnp.dot(h, w2_ref[...], preferred_element_type=jnp.float32) + b2_ref[...]
    o_ref[...] = out.astype(o_ref.dtype)


def prepare_params(params):
    """One-time padding + bf16 casting of MnistModel parameters.

    params = (w1, b1, w2, b2) with w stored as [in_features, out_features]
    (transpose of torch's Linear.weight), all f32. Call once; reuse the result
    for every forward call so no per-call padding/casting ops are emitted.
    """
    w1, b1, w2, b2 = params
    in_size, hidden = w1.shape
    out_size = w2.shape[1]
    hid_p = _round_up(hidden, 128)
    out_p = _round_up(out_size, 128)
    # Zero padding is exact: padded hidden columns give relu(0)=0 which meets
    # zero rows of w2; padded output columns are sliced off after the kernel.
    w1_p = jnp.zeros((in_size, hid_p), jnp.bfloat16).at[:, :hidden].set(
        w1.astype(jnp.bfloat16))
    b1_p = jnp.zeros((1, hid_p), jnp.float32).at[:, :hidden].set(
        b1.reshape(1, hidden).astype(jnp.float32))
    w2_p = jnp.zeros((hid_p, out_p), jnp.bfloat16).at[:hidden, :out_size].set(
        w2.astype(jnp.bfloat16))
    b2_p = jnp.zeros((1, out_p), jnp.float32).at[:, :out_size].set(
        b2.reshape(1, out_size).astype(jnp.float32))
    return (w1_p, b1_p, w2_p, b2_p)


def _choose_batch_tile(B: int, batch_tile: int) -> int:
    # Small batch: one block covering the whole batch. A block dim equal to the
    # full array dim is always layout-legal and needs no partial-block handling.
    if B <= 32:
        return B
    # Otherwise: at least two tiles so v7x's second TensorCore gets work via
    # dimension_semantics=("parallel",); rows a multiple of 16; capped at
    # batch_tile. The last tile may be partial: Pallas only DMAs the valid
    # rows, so un-padded batches cost no extra HBM traffic.
    tb = _round_up(-(-B // 2), 16)          # round_up(cdiv(B, 2), 16)
    return max(16, min(batch_tile, tb))


def mnist_model_forward(x_nchw, prepared_params, out_size, *, batch_tile=512):
    """Forward pass of MnistModel.

    x_nchw: [B, ...] float32 (flattened row-major like torch's xb.view(B, -1)).
    prepared_params: output of prepare_params().
    out_size: number of classes (static int).
    """
    w1_p, b1_p, w2_p, b2_p = prepared_params
    B = x_nchw.shape[0]
    in_size = math.prod(x_nchw.shape[1:])
    hid_p = w1_p.shape[1]
    out_p = w2_p.shape[1]
    assert w1_p.shape[0] == in_size, "prepared params do not match input size"

    # Flatten exactly like torch's xb.view(B, -1): metadata-only, no HBM copy.
    x2d = x_nchw.reshape(B, in_size)

    tb = _choose_batch_tile(B, batch_tile)
    grid = (pl.cdiv(B, tb),)

    out_padded = pl.pallas_call(
        mlp_kernel,
        out_shape=jax.ShapeDtypeStruct((B, out_p), jnp.float32),
        grid_spec=pl.GridSpec(
            grid=grid,
            in_specs=[
                # Streamed activation tile; full-K block (last dim == full
                # array dim), read from HBM exactly once, bf16 cast in-kernel.
                pl.BlockSpec((tb, in_size), lambda i: (i, 0)),
                # Weights / biases: constant index_map -> resident in VMEM.
                # (pipeline_mode=pl.Buffered(1) would halve their footprint,
                # but VMEM use is tiny at these sizes, so keep defaults.)
                pl.BlockSpec((in_size, hid_p), lambda i: (0, 0)),
                pl.BlockSpec((1, hid_p), lambda i: (0, 0)),
                pl.BlockSpec((hid_p, out_p), lambda i: (0, 0)),
                pl.BlockSpec((1, out_p), lambda i: (0, 0)),
            ],
            out_specs=pl.BlockSpec((tb, out_p), lambda i: (i, 0)),
        ),
        compiler_params=pltpu.CompilerParams(
            # Independent batch tiles: shard across TensorCores on v7x.
            dimension_semantics=("parallel",),
            # Explicit VMEM budget; well under v7x's 64 MiB physical VMEM.
            vmem_limit_bytes=32 * 1024 * 1024,
        ),
    )(x2d, w1_p, b1_p, w2_p, b2_p)

    # Drop class-column padding (batch is never padded). Under jit this slice
    # fuses into the consumer.
    return out_padded[:, :out_size]


def init_params(key, in_size, hidden_size, out_size):
    """Deterministic init mimicking nn.Linear's default (uniform +-1/sqrt(fan_in)).

    Weights stored as [in_features, out_features] (transposed vs torch)."""
    k1, k2, k3, k4 = jax.random.split(key, 4)
    bound1 = 1.0 / jnp.sqrt(in_size)
    bound2 = 1.0 / jnp.sqrt(hidden_size)
    w1 = jax.random.uniform(k1, (in_size, hidden_size), jnp.float32, -bound1, bound1)
    b1 = jax.random.uniform(k2, (1, hidden_size), jnp.float32, -bound1, bound1)
    w2 = jax.random.uniform(k3, (hidden_size, out_size), jnp.float32, -bound2, bound2)
    b2 = jax.random.uniform(k4, (1, out_size), jnp.float32, -bound2, bound2)
    return w1, b1, w2, b2


if __name__ == "__main__":
    # Small MNIST-like shapes: batch=2, 1 channel, 16x16 image -> in_size=256,
    # hidden=32, out=10 classes.
    B, C, H, W = 2, 1, 16, 16
    in_size = C * H * W
    hidden_size = 32
    out_size = 10

    key = jax.random.PRNGKey(0)
    kx, kp = jax.random.split(key)
    x = jax.random.normal(kx, (B, C, H, W), jnp.float32)
    params = init_params(kp, in_size, hidden_size, out_size)

    # One-time parameter preparation (pad + bf16 cast), hoisted out of forward.
    prepared = prepare_params(params)

    fwd = jax.jit(mnist_model_forward, static_argnums=(2,))
    out = fwd(x, prepared, out_size)
    out = jax.block_until_ready(out)
    assert out.shape == (B, out_size)

    # Reference with the same bf16-operand / f32-accumulation recipe.
    w1, b1, w2, b2 = params
    xb = x.reshape(B, -1).astype(jnp.bfloat16)
    h_ref = jnp.maximum(
        jnp.dot(xb, w1.astype(jnp.bfloat16), preferred_element_type=jnp.float32) + b1,
        0.0)
    ref = jnp.dot(h_ref.astype(jnp.bfloat16), w2.astype(jnp.bfloat16),
                  preferred_element_type=jnp.float32) + b2
    assert jnp.allclose(out, ref, atol=1e-2, rtol=1e-2)

    # Also stay reasonably close to the full-f32 PyTorch-equivalent forward.
    # (bf16 MXU operands with f32 accumulation is an intentional precision
    # choice; acceptable for MNIST logits.)
    ref_f32 = jnp.maximum(x.reshape(B, -1) @ w1 + b1, 0.0) @ w2 + b2
    assert jnp.allclose(out, ref_f32, atol=5e-2, rtol=5e-2)

    print("KERNEL_OK")
</pallas_src>

<mosaic_0001>
module attributes {stable_mosaic.version = 11 : i64} {
  func.func @mlp_kernel(%arg0: i32, %arg1: memref<2x256xf32, #tpu.memory_space<vmem>>, %arg2: memref<256x128xbf16, #tpu.memory_space<vmem>>, %arg3: memref<1x128xf32, #tpu.memory_space<vmem>>, %arg4: memref<128x128xbf16, #tpu.memory_space<vmem>>, %arg5: memref<1x128xf32, #tpu.memory_space<vmem>>, %arg6: memref<2x128xf32, #tpu.memory_space<vmem>>) attributes {dimension_semantics = [#tpu.dimension_semantics<parallel>], iteration_bounds = array<i64: 1>, scalar_prefetch = 0 : i64, scratch_operands = 0 : i64, tpu.core_type = #tpu.core_type<tc>, window_params = [{transform_indices = @transform_0, window_bounds = array<i64: 2, 256>}, {pipeline_mode = #tpu.pipeline_mode<synchronous>, transform_indices = @transform_1, window_bounds = array<i64: 256, 128>}, {pipeline_mode = #tpu.pipeline_mode<synchronous>, transform_indices = @transform_2, window_bounds = array<i64: 1, 128>}, {pipeline_mode = #tpu.pipeline_mode<synchronous>, transform_indices = @transform_3, window_bounds = array<i64: 128, 128>}, {pipeline_mode = #tpu.pipeline_mode<synchronous>, transform_indices = @transform_4, window_bounds = array<i64: 1, 128>}, {transform_indices = @transform_5, window_bounds = array<i64: 2, 128>}]} {
    %c0 = arith.constant 0 : index
    %c0_0 = arith.constant 0 : index
    %0 = vector.load %arg1[%c0, %c0_0] : memref<2x256xf32, #tpu.memory_space<vmem>>, vector<2x256xf32>
    %1 = arith.truncf %0 : vector<2x256xf32> to vector<2x256xbf16>
    %c0_1 = arith.constant 0 : index
    %c0_2 = arith.constant 0 : index
    %2 = vector.load %arg2[%c0_1, %c0_2] : memref<256x128xbf16, #tpu.memory_space<vmem>>, vector<256x128xbf16>
    %cst = arith.constant dense<0.000000e+00> : vector<2x128xf32>
    %3 = tpu.matmul %1, %2, %cst {dimension_numbers = #tpu.dot_dimension_numbers<[1], [0], [0], [1], [0, 0, 1, 1], [], []>} : vector<2x256xbf16>, vector<256x128xbf16>, vector<2x128xf32> -> vector<2x128xf32>
    %c0_3 = arith.constant 0 : index
    %c0_4 = arith.constant 0 : index
    %4 = vector.load %arg3[%c0_3, %c0_4] : memref<1x128xf32, #tpu.memory_space<vmem>>, vector<1x128xf32>
    %5 = vector.broadcast %4 : vector<1x128xf32> to vector<2x128xf32>
    %6 = arith.addf %3, %5 : vector<2x128xf32>
    %cst_5 = arith.constant 0.000000e+00 : f32
    %7 = vector.broadcast %cst_5 : f32 to vector<2x128xf32>
    %8 = arith.maximumf %6, %7 : vector<2x128xf32>
    %9 = arith.truncf %8 : vector<2x128xf32> to vector<2x128xbf16>
    %c0_6 = arith.constant 0 : index
    %c0_7 = arith.constant 0 : index
    %10 = vector.load %arg4[%c0_6, %c0_7] : memref<128x128xbf16, #tpu.memory_space<vmem>>, vector<128x128xbf16>
    %cst_8 = arith.constant dense<0.000000e+00> : vector<2x128xf32>
    %11 = tpu.matmul %9, %10, %cst_8 {dimension_numbers = #tpu.dot_dimension_numbers<[1], [0], [0], [1], [0, 0, 1, 1], [], []>} : vector<2x128xbf16>, vector<128x128xbf16>, vector<2x128xf32> -> vector<2x128xf32>
    %c0_9 = arith.constant 0 : index
    %c0_10 = arith.constant 0 : index
    %12 = vector.load %arg5[%c0_9, %c0_10] : memref<1x128xf32, #tpu.memory_space<vmem>>, vector<1x128xf32>
    %13 = vector.broadcast %12 : vector<1x128xf32> to vector<2x128xf32>
    %14 = arith.addf %11, %13 : vector<2x128xf32>
    %c0_11 = arith.constant 0 : index
    %c0_12 = arith.constant 0 : index
    %15 = vector.load %arg6[%c0_11, %c0_12] : memref<2x128xf32, #tpu.memory_space<vmem>>, vector<2x128xf32>
    tpu.vector_store %arg6[%c0_11, %c0_12], %14 {strides = array<i32>} : memref<2x128xf32, #tpu.memory_space<vmem>>, vector<2x128xf32>,
    return
  }
  func.func @transform_0(%arg0: i32) -> (i32, i32) {
    %c0_i32 = arith.constant 0 : i32
    %c0_i32_0 = arith.constant 0 : i32
    return %arg0, %c0_i32 : i32, i32
  }
  func.func @transform_1(%arg0: i32) -> (i32, i32) {
    %c0_i32 = arith.constant 0 : i32
    %c0_i32_0 = arith.constant 0 : i32
    %c0_i32_1 = arith.constant 0 : i32
    return %c0_i32, %c0_i32_0 : i32, i32
  }
  func.func @transform_2(%arg0: i32) -> (i32, i32) {
    %c0_i32 = arith.constant 0 : i32
    %c0_i32_0 = arith.constant 0 : i32
    %c0_i32_1 = arith.constant 0 : i32
    return %c0_i32, %c0_i32_0 : i32, i32
  }
  func.func @transform_3(%arg0: i32) -> (i32, i32) {
    %c0_i32 = arith.constant 0 : i32
    %c0_i32_0 = arith.constant 0 : i32
    %c0_i32_1 = arith.constant 0 : i32
    return %c0_i32, %c0_i32_0 : i32, i32
  }
  func.func @transform_4(%arg0: i32) -> (i32, i32) {
    %c0_i32 = arith.constant 0 : i32
    %c0_i32_0 = arith.constant 0 : i32
    %c0_i32_1 = arith.constant 0 : i32
    return %c0_i32, %c0_i32_0 : i32, i32
  }
  func.func @transform_5(%arg0: i32) -> (i32, i32) {
    %c0_i32 = arith.constant 0 : i32
    %c0_i32_0 = arith.constant 0 : i32
    return %arg0, %c0_i32 : i32, i32
  }
}

</mosaic_0001>

<bundles_post_ra>
// kernel: mnist_model_forward.1
= control target key start
LH: loop header
LB: loop body
LE: loop exit
PB: predicated region body
PF: predicated region fallthrough
CT: control target
= control target key end

     0   :  { %10 = vsyncpa [#allocation3], 0  ;;  %s641_s0 = inlined_call_operand.vmem [shape: f32[2,256], index: 0, kind: input, shape index: {}]   ;;  %s642_s1 = inlined_call_operand.hbm [shape: bf16[256,128], index: 1, kind: input, shape index: {}]   ;;  %s643_s2 = inlined_call_operand.vmem [shape: f32[1,128], index: 2, kind: input, shape index: {}]   ;;  %s644_s3 = inlined_call_operand.hbm [shape: bf16[128,128], index: 3, kind: input, shape index: {}]   ;;  %s645_s4 = inlined_call_operand.vmem [shape: f32[1,128], index: 4, kind: input, shape index: {}]   ;;  %s646_s5 = inlined_call_operand.hbm [shape: f32[2,128], index: 5, kind: output, shape index: {}]  }
   0x1   :  { %11 = vsyncpa [#allocation6], 0 }
   0x2   :  { %12 = vsyncpa [#allocation4], 0  ;;  %s550_s18 = smov [#allocation2]   ;;  %s478_s22 = scalar_lea.hbm %s642_s1, 2048 }
   0x3   :  { %s20_s19 = sshll.u32 %s550_s18, 4  ;;  %p479_p0 = scmp.ne.s32.totalorder %s642_s1, %s478_s22  ;;  %s21_s19 = int_to_ptr.vmem [resolvable:$true] %s20_s19 }
   0x4   :  { %p482_p1 = scmp.lt.u32.totalorder %s478_s22, %s642_s1 }
   0x6   :  { %p484_p2 = pnand %p482_p1, %p479_p0 }
   0x8   :  { %487 = shalt.err (!%p484_p2)
}
   0x9   :  { %s488_s27 = scalar_lea.vmem %s21_s19, 2048  ;;  %p493_p4 = scmp.lt.s32.totalorder %s21_s19, %s21_s19 }
   0xa   :  { %p489_p3 = scmp.ne.s32.totalorder %s21_s19, %s488_s27  ;;  %p494_p5 = scmp.lt.s32.totalorder %s488_s27, %s488_s27 }
   0xc   :  { %p495_p6 = por %p494_p5, %p493_p4 }
   0xe   :  { %p496_p7 = pnand %p495_p6, %p489_p3 }
  0x10   :  { %499 = shalt.err (!%p496_p7)
}
  0x11   :  { %s551_s28 = smov 64   ;;  %s552_s29 = smov 4  }
  0x12   :  { %26 = dma.hbm_to_vmem [thread:$0]  %s642_s1, 2048, %s21_s19, [#allocation3], %s551_s28, %s551_s28, %s552_s29  }
  0x13   :  { %s553_s7 = smov [#allocation5]   ;;  %s500_s11 = scalar_lea.hbm %s644_s3, 1024 }
  0x14   :  { %s34_s8 = sshll.u32 %s553_s7, 4  ;;  %p501_p8 = scmp.ne.s32.totalorder %s644_s3, %s500_s11  ;;  %s35_s8 = int_to_ptr.vmem [resolvable:$true] %s34_s8 }
  0x15   :  { %p504_p9 = scmp.lt.u32.totalorder %s500_s11, %s644_s3 }
  0x17   :  { %p506_p10 = pnand %p504_p9, %p501_p8 }
  0x19   :  { %509 = shalt.err (!%p506_p10)
}
  0x1a   :  { %s510_s16 = scalar_lea.vmem %s35_s8, 1024  ;;  %p515_p12 = scmp.lt.s32.totalorder %s35_s8, %s35_s8 }
  0x1b   :  { %p511_p11 = scmp.ne.s32.totalorder %s35_s8, %s510_s16  ;;  %p516_p13 = scmp.lt.s32.totalorder %s510_s16, %s510_s16 }
  0x1d   :  { %p517_p0 = por %p516_p13, %p515_p12 }
  0x1f   :  { %p518_p1 = pnand %p517_p0, %p511_p11 }
  0x21   :  { %521 = shalt.err (!%p518_p1)
}
  0x22   :  { %40 = dma.hbm_to_vmem [thread:$0]  %s644_s3, 1024, %s35_s8, [#allocation6], %s551_s28, %s551_s28, %s552_s29  }
  0x23   :  { %544 = dma.done.wait [#allocation3], 2048  }
  0x24   :  { %545 = vsyncadd [#allocation3], 4294965248 }
  0x25   :  { %546 = dma.done.wait [#allocation6], 1024  }
  0x26   :  { %547 = vsyncadd [#allocation6], 4294966272  ;;  %v554_v0 = vmov 0.0   ;;  %v454_v1 = vld [vmem:[#allocation2 + $0x40] sm:$0xff]   ;;  %v456_v3 = vld [vmem:[#allocation2 + $0x48] sm:$0xff]   ;;  %vm555_vm0 = vmmov 0  }
  0x27   :  { %427 = vmatprep.subr.bf16.mxu1 %v554_v0  ;;  %v455_v2 = vld [vmem:[#allocation2] sm:$0xff]   ;;  %396 = vmatprep.subr.bf16.mxu0 %v454_v1  ;;  %v457_v4 = vld [vmem:[#allocation2 + $0x8] sm:$0xff]   ;;  %v458_v5 = vld [vmem:[#allocation2 + $0x50] sm:$0xff]   ;;  %s556_s22 = smov [#allocation7]  }
  0x28   :  { %397 = vmatpush3.bf16.msra.mxu0 %v455_v2  ;;  %v459_v6 = vld [vmem:[#allocation2 + $0x10] sm:$0xff]   ;;  %v460_v7 = vld [vmem:[#allocation2 + $0x58] sm:$0xff]   ;;  %v462_v9 = vld [vmem:[#allocation2 + $0x60] sm:$0xff]   ;;  %443 = vmatprep.mubr.msk.bf16.mxu1 %vm555_vm0, %v554_v0  ;;  %s359_s23 = sshll.u32 %s556_s22, 4  ;;  %s360_s23 = int_to_ptr.vmem [resolvable:$true] %s359_s23 }
  0x29   :  { %398 = vmatprep.subr.bf16.mxu0 %v456_v3  ;;  %v461_v8 = vld [vmem:[#allocation2 + $0x18] sm:$0xff]   ;;  %v463_v10 = vld [vmem:[#allocation2 + $0x20] sm:$0xff]   ;;  %v464_v11 = vld [vmem:[#allocation2 + $0x68] sm:$0xff]   ;;  %p527_p3 = scmp.lt.s32.totalorder %s360_s23, %s360_s23 }
  0x2a   :  { %v369_v12 = vld.sshfl [vmem:[%s641_s0] sm:$0x33 pattern:$0x76325410]  ;;  %v465_v15 = vld [vmem:[#allocation2 + $0x28] sm:$0xff]   ;;  %v466_v18 = vld [vmem:[#allocation2 + $0x70] sm:$0xff]  }
  0x2b   :  { %v59_v13 = vcombine.high %v369_v12, %v369_v12  ;;  %v470_v14 = vld [vmem:[#allocation5] sm:$0xff]   ;;  %v471_v17 = vld [vmem:[#allocation5 + $0x8] sm:$0xff]   ;;  %v467_v19 = vld [vmem:[#allocation2 + $0x30] sm:$0xff]   ;;  %v62_v24 = vpack.c.bf16 %v369_v12, %v369_v12 }
  0x2c   :  { %399 = vmatpush3.bf16.msra.mxu0 %v457_v4  ;;  %428 = vmatpush3.bf16.msra.mxu1 %v470_v14  ;;  %v472_v20 = vld [vmem:[#allocation5 + $0x10] sm:$0xff]   ;;  %v468_v21 = vld [vmem:[#allocation2 + $0x78] sm:$0xff]   ;;  %v474_v25 = vld [vmem:[#allocation5 + $0x20] sm:$0xff]  }
  0x2d   :  { %400 = vmatprep.subr.bf16.mxu0 %v458_v5  ;;  %v63_v16 = vpack.c.bf16 %v59_v13, %v59_v13  ;;  %429 = vmatprep.subr.bf16.mxu1 %v554_v0  ;;  %v469_v22 = vld [vmem:[#allocation2 + $0x38] sm:$0xff]   ;;  %v475_v26 = vld [vmem:[#allocation5 + $0x28] sm:$0xff]   ;;  %v476_v27 = vld [vmem:[#allocation5 + $0x30] sm:$0xff]  }
  0x2e   :  { %v473_v23 = vld [vmem:[#allocation5 + $0x18] sm:$0xff]   ;;  %v370_v30 = vld [vmem:[%s643_s2] ss:$0 sm:$0xff]  ;;  %s522_s2 = scalar_lea.vmem %s360_s23, 32 }
  0x2f   :  { %231 = vmatprep.mubr.bf16.mxu0 %v63_v16  ;;  %v477_v28 = vld [vmem:[#allocation5 + $0x38] sm:$0xff]   ;;  %v387_v38 = vld [vmem:[%s645_s4] ss:$0 sm:$0xff]  ;;  %p523_p2 = scmp.ne.s32.totalorder %s360_s23, %s522_s2  ;;  %p528_p4 = scmp.lt.s32.totalorder %s522_s2, %s522_s2 }
  0x30   :  { %401 = vmatpush3.bf16.msra.mxu0 %v459_v6  ;;  %430 = vmatpush3.bf16.msra.mxu1 %v471_v17 }
  0x31   :  { %402 = vmatprep.subr.bf16.mxu0 %v460_v7  ;;  %431 = vmatprep.subr.bf16.mxu1 %v554_v0  ;;  %p529_p5 = por %p528_p4, %p527_p3 }
  0x33   :  { %p530_p6 = pnand %p529_p5, %p523_p2 }
  0x34   :  { %403 = vmatpush3.bf16.msra.mxu0 %v461_v8  ;;  %432 = vmatpush3.bf16.msra.mxu1 %v472_v20 }
  0x35   :  { %404 = vmatprep.subr.bf16.mxu0 %v462_v9  ;;  %433 = vmatprep.subr.bf16.mxu1 %v554_v0 }
  0x38   :  { %405 = vmatpush3.bf16.msra.mxu0 %v463_v10  ;;  %434 = vmatpush3.bf16.msra.mxu1 %v473_v23 }
  0x39   :  { %406 = vmatprep.subr.bf16.mxu0 %v464_v11  ;;  %435 = vmatprep.subr.bf16.mxu1 %v554_v0 }
  0x3c   :  { %407 = vmatpush3.bf16.msra.mxu0 %v465_v15  ;;  %436 = vmatpush3.bf16.msra.mxu1 %v474_v25 }
  0x3d   :  { %408 = vmatprep.subr.bf16.mxu0 %v466_v18  ;;  %437 = vmatprep.subr.bf16.mxu1 %v554_v0 }
  0x40   :  { %409 = vmatpush3.bf16.msra.mxu0 %v467_v19  ;;  %438 = vmatpush3.bf16.msra.mxu1 %v475_v26 }
  0x41   :  { %410 = vmatprep.subr.bf16.mxu0 %v468_v21  ;;  %439 = vmatprep.subr.bf16.mxu1 %v554_v0 }
  0x44   :  { %411 = vmatpush3.bf16.msra.mxu0 %v469_v22  ;;  %440 = vmatpush3.bf16.msra.mxu1 %v476_v27 }
  0x45   :  { %441 = vmatprep.subr.bf16.mxu1 %v554_v0 }
  0x47   :  { %232 = vmatmul.mubr.bf16.vlgmr.msra.gmra.mrb[0].mxu0 %v62_v24 }
  0x48   :  { %442 = vmatpush3.bf16.msra.mxu1 %v477_v28 }
 0x11a   :  { %v412_v29 = vpop.f32.mrb[0].mxu0 }
 0x11b   :  { %v413_v31 = vpop.f32.mrb[1].mxu0 }
 0x11c   :  { %v414_v32 = vadd.f32 %v413_v31, %v412_v29  ;;  %v415_v33 = vpop.f32.mrb[2].mxu0 }
 0x11d   :  { %v416_v34 = vpop.f32.mrb[3].mxu0 }
 0x11e   :  { %v234_v35 = vadd.f32 %v414_v32, %v370_v30 }
 0x120   :  { %v239_v36 = vmax.f32 %v234_v35, 0.0 }
 0x122   :  { %v240_v37 = vpack.c.bf16 %v239_v36, %v239_v36 }
 0x124   :  { %444 = vmatmul.mubr.bf16.vlgmr.msra.gmra.mrb[0].mxu1 %v240_v37 }
 0x1f7   :  { %v346_v39 = vpop.f32.mrb[0].mxu1 }
 0x1f8   :  { %v347_v40 = vadd.f32 %v387_v38, %v346_v39  ;;  %v445_v41 = vpop.f32.mrb[1].mxu1 }
 0x1f9   :  { %v349_v42 = vpop.f32.mrb[2].mxu1 }
 0x1fa   :  { %352 = vst [vmem:[#allocation7] sm:$0x3] %v347_v40  ;;  %v446_v43 = vpop.f32.mrb[3].mxu1 }
 0x1fb   :  { %533 = shalt.err (!%p530_p6)
}
 0x1fc   :  { %s534_s4 = scalar_lea.hbm %s646_s5, 32 }
 0x1fd   :  { %p535_p7 = scmp.ne.s32.totalorder %s646_s5, %s534_s4  ;;  %p538_p8 = scmp.lt.u32.totalorder %s534_s4, %s646_s5 }
 0x1ff   :  { %p540_p9 = pnand %p538_p8, %p535_p7 }
 0x201   :  { %543 = shalt.err (!%p540_p9)
}
 0x202   :  { %362 = dma.vmem_to_hbm [thread:$0]  %s360_s23, 32, %s646_s5, [#allocation4]  }
 0x203   :  { %548 = dma.done.wait [#allocation4], 32  }
 0x204   :  { %549 = vsyncadd [#allocation4], 4294967264 }
 0x205   :  { %366 = vsyncpa [#allocation3], 1 }
 0x206   :  { %367 = vsyncpa [#allocation6], 1 }
 0x207   :  { %368 = vsyncpa [#allocation4], 1 }

</bundles_post_ra>
